<compile_context>
chip_gen: v5e
topology: v5e:2x2
jax: 0.10.0
libtpu: 0.0.40
codegen_flags: <defaults>
</compile_context>

<pallas_src>
import functools

import jax
import jax.numpy as jnp
from jax.experimental import pallas as pl
from jax.experimental.pallas import tpu as pltpu


def _round_up(x, m):
    return ((x + m - 1) // m) * m


def _autoencoder_kernel(x_ref, w1_ref, b1_ref, w2_ref, b2_ref, out_ref):
    # x_ref:  (TM, D)       one batch tile of flattened input
    # w1_ref: (D, HID), b1_ref: (1, HID)   encoder Linear (resident)
    # w2_ref: (HID, D), b2_ref: (1, D)     decoder Linear (resident)
    x = x_ref[...]

    # --- encoder: Linear + ReLU (MXU matmul, f32 accumulation) ---
    h = jnp.dot(x, w1_ref[...], preferred_element_type=jnp.float32) + b1_ref[...]
    h = jnp.maximum(h, 0.0)

    # --- decoder: Linear + Sigmoid ---
    y = jnp.dot(h, w2_ref[...], preferred_element_type=jnp.float32) + b2_ref[...]
    out_ref[...] = jax.nn.sigmoid(y).astype(out_ref.dtype)


@functools.partial(jax.jit, static_argnames=("block_m",))
def autoencoder_forward(x_nchw, w1, b1, w2, b2, block_m=128):
    """x_nchw: (N, C, H, W) float32 -> (N, C, H, W) float32."""
    n, c, h, w = x_nchw.shape
    d = c * h * w
    hid = w1.shape[1]

    x_flat = x_nchw.reshape(n, d)

    # ---- batch (M) tiling ----------------------------------------------------
    # Pad N up to a sublane multiple (8 for f32); tile at block_m (128 is a good
    # default on v5e, also fine on v6e/v7x) when the batch is large enough.
    tm = min(block_m, _round_up(n, 8))
    n_pad = _round_up(n, tm)
    if n_pad != n:
        x_flat = jnp.pad(x_flat, ((0, n_pad - n), (0, 0)))

    grid = (n_pad // tm,)

    out_flat = pl.pallas_call(
        _autoencoder_kernel,
        out_shape=jax.ShapeDtypeStruct((n_pad, d), jnp.float32),
        grid=grid,
        in_specs=[
            pl.BlockSpec((tm, d), lambda i: (i, 0)),    # x tile: streamed per step
            pl.BlockSpec((d, hid), lambda i: (0, 0)),   # w1: fetched once, resident
            pl.BlockSpec((1, hid), lambda i: (0, 0)),   # b1: resident
            pl.BlockSpec((hid, d), lambda i: (0, 0)),   # w2: fetched once, resident
            pl.BlockSpec((1, d), lambda i: (0, 0)),     # b2: resident
        ],
        # Full-D output block (D multiple of 128) -> lane-dense unmasked stores.
        out_specs=pl.BlockSpec((tm, d), lambda i: (i, 0)),
        compiler_params=pltpu.CompilerParams(
            # Batch tiles are independent -> megacore sharding on v7x (2 TCs).
            dimension_semantics=("parallel",),
        ),
    )(x_flat, w1, b1.reshape(1, hid), w2, b2.reshape(1, d))

    return out_flat[:n].reshape(n, c, h, w)


def init_params(key, d, hid):
    """Deterministic init mimicking PyTorch nn.Linear defaults
    (uniform(-1/sqrt(fan_in), 1/sqrt(fan_in)))."""
    k1, k2, k3, k4 = jax.random.split(key, 4)
    bound1 = 1.0 / jnp.sqrt(d)
    bound2 = 1.0 / jnp.sqrt(hid)
    w1 = jax.random.uniform(k1, (d, hid), jnp.float32, -bound1, bound1)
    b1 = jax.random.uniform(k2, (hid,), jnp.float32, -bound1, bound1)
    w2 = jax.random.uniform(k3, (hid, d), jnp.float32, -bound2, bound2)
    b2 = jax.random.uniform(k4, (d,), jnp.float32, -bound2, bound2)
    return w1, b1, w2, b2


def reference_forward(x_nchw, w1, b1, w2, b2):
    """Pure-JAX reference for correctness check."""
    n = x_nchw.shape[0]
    x = x_nchw.reshape(n, -1)
    h = jnp.maximum(x @ w1 + b1, 0.0)
    y = jax.nn.sigmoid(h @ w2 + b2)
    return y.reshape(x_nchw.shape)


if __name__ == "__main__":
    # Small shapes consistent with an NCHW conv-style input.
    N, C, H, W = 2, 4, 16, 16
    HID = 128
    D = C * H * W  # 1024

    key = jax.random.PRNGKey(0)
    kx, kp = jax.random.split(key)
    x = jax.random.normal(kx, (N, C, H, W), jnp.float32)
    w1, b1, w2, b2 = init_params(kp, D, HID)

    out = autoencoder_forward(x, w1, b1, w2, b2)
    out = jax.block_until_ready(out)
    ref = reference_forward(x, w1, b1, w2, b2)
    assert out.shape == (N, C, H, W)
    assert jnp.allclose(out, ref, atol=1e-5, rtol=1e-5), "mismatch vs reference"

    # Second check exercising the multi-tile (grid > 1) path with batch padding:
    # N=20 padded to 24, TM=8 -> grid=(3,), batch axis pipelined & parallel.
    N2 = 20
    x2 = jax.random.normal(jax.random.PRNGKey(1), (N2, C, H, W), jnp.float32)
    out2 = jax.block_until_ready(autoencoder_forward(x2, w1, b1, w2, b2, block_m=8))
    ref2 = reference_forward(x2, w1, b1, w2, b2)
    assert out2.shape == (N2, C, H, W)
    assert jnp.allclose(out2, ref2, atol=1e-5, rtol=1e-5), "mismatch vs reference (tiled)"

    print("KERNEL_OK")
</pallas_src>

<mosaic_0001>
module attributes {stable_mosaic.version = 11 : i64} {
  func.func @_autoencoder_kernel(%arg0: i32, %arg1: memref<8x1024xf32, #tpu.memory_space<vmem>>, %arg2: memref<1024x128xf32, #tpu.memory_space<vmem>>, %arg3: memref<1x128xf32, #tpu.memory_space<vmem>>, %arg4: memref<128x1024xf32, #tpu.memory_space<vmem>>, %arg5: memref<1x1024xf32, #tpu.memory_space<vmem>>, %arg6: memref<8x1024xf32, #tpu.memory_space<vmem>>) attributes {dimension_semantics = [#tpu.dimension_semantics<parallel>], iteration_bounds = array<i64: 1>, scalar_prefetch = 0 : i64, scratch_operands = 0 : i64, tpu.core_type = #tpu.core_type<tc>, window_params = [{transform_indices = @transform_0, window_bounds = array<i64: 8, 1024>}, {pipeline_mode = #tpu.pipeline_mode<synchronous>, transform_indices = @transform_1, window_bounds = array<i64: 1024, 128>}, {pipeline_mode = #tpu.pipeline_mode<synchronous>, transform_indices = @transform_2, window_bounds = array<i64: 1, 128>}, {pipeline_mode = #tpu.pipeline_mode<synchronous>, transform_indices = @transform_3, window_bounds = array<i64: 128, 1024>}, {pipeline_mode = #tpu.pipeline_mode<synchronous>, transform_indices = @transform_4, window_bounds = array<i64: 1, 1024>}, {transform_indices = @transform_5, window_bounds = array<i64: 8, 1024>}]} {
    %c0 = arith.constant 0 : index
    %c0_0 = arith.constant 0 : index
    %0 = vector.load %arg1[%c0, %c0_0] : memref<8x1024xf32, #tpu.memory_space<vmem>>, vector<8x1024xf32>
    %c0_1 = arith.constant 0 : index
    %c0_2 = arith.constant 0 : index
    %1 = vector.load %arg2[%c0_1, %c0_2] : memref<1024x128xf32, #tpu.memory_space<vmem>>, vector<1024x128xf32>
    %cst = arith.constant dense<0.000000e+00> : vector<8x128xf32>
    %2 = tpu.matmul %0, %1, %cst {dimension_numbers = #tpu.dot_dimension_numbers<[1], [0], [0], [1], [0, 0, 1, 1], [], []>} : vector<8x1024xf32>, vector<1024x128xf32>, vector<8x128xf32> -> vector<8x128xf32>
    %c0_3 = arith.constant 0 : index
    %c0_4 = arith.constant 0 : index
    %3 = vector.load %arg3[%c0_3, %c0_4] : memref<1x128xf32, #tpu.memory_space<vmem>>, vector<1x128xf32>
    %4 = vector.broadcast %3 : vector<1x128xf32> to vector<8x128xf32>
    %5 = arith.addf %2, %4 : vector<8x128xf32>
    %cst_5 = arith.constant 0.000000e+00 : f32
    %6 = vector.broadcast %cst_5 : f32 to vector<8x128xf32>
    %7 = arith.maximumf %5, %6 : vector<8x128xf32>
    %c0_6 = arith.constant 0 : index
    %c0_7 = arith.constant 0 : index
    %8 = vector.load %arg4[%c0_6, %c0_7] : memref<128x1024xf32, #tpu.memory_space<vmem>>, vector<128x1024xf32>
    %cst_8 = arith.constant dense<0.000000e+00> : vector<8x1024xf32>
    %9 = tpu.matmul %7, %8, %cst_8 {dimension_numbers = #tpu.dot_dimension_numbers<[1], [0], [0], [1], [0, 0, 1, 1], [], []>} : vector<8x128xf32>, vector<128x1024xf32>, vector<8x1024xf32> -> vector<8x1024xf32>
    %c0_9 = arith.constant 0 : index
    %c0_10 = arith.constant 0 : index
    %10 = vector.load %arg5[%c0_9, %c0_10] : memref<1x1024xf32, #tpu.memory_space<vmem>>, vector<1x1024xf32>
    %11 = vector.broadcast %10 : vector<1x1024xf32> to vector<8x1024xf32>
    %12 = arith.addf %9, %11 : vector<8x1024xf32>
    %13 = arith.negf %12 : vector<8x1024xf32>
    %14 = math.exp %13 : vector<8x1024xf32>
    %cst_11 = arith.constant 1.000000e+00 : f32
    %15 = vector.broadcast %cst_11 : f32 to vector<8x1024xf32>
    %16 = arith.addf %15, %14 : vector<8x1024xf32>
    %17 = arith.divf %15, %16 : vector<8x1024xf32>
    %c0_12 = arith.constant 0 : index
    %c0_13 = arith.constant 0 : index
    %18 = vector.load %arg6[%c0_12, %c0_13] : memref<8x1024xf32, #tpu.memory_space<vmem>>, vector<8x1024xf32>
    tpu.vector_store %arg6[%c0_12, %c0_13], %17 {strides = array<i32>} : memref<8x1024xf32, #tpu.memory_space<vmem>>, vector<8x1024xf32>,
    return
  }
  func.func @transform_0(%arg0: i32) -> (i32, i32) {
    %c0_i32 = arith.constant 0 : i32
    %c0_i32_0 = arith.constant 0 : i32
    return %arg0, %c0_i32 : i32, i32
  }
  func.func @transform_1(%arg0: i32) -> (i32, i32) {
    %c0_i32 = arith.constant 0 : i32
    %c0_i32_0 = arith.constant 0 : i32
    %c0_i32_1 = arith.constant 0 : i32
    return %c0_i32, %c0_i32_0 : i32, i32
  }
  func.func @transform_2(%arg0: i32) -> (i32, i32) {
    %c0_i32 = arith.constant 0 : i32
    %c0_i32_0 = arith.constant 0 : i32
    %c0_i32_1 = arith.constant 0 : i32
    return %c0_i32, %c0_i32_0 : i32, i32
  }
  func.func @transform_3(%arg0: i32) -> (i32, i32) {
    %c0_i32 = arith.constant 0 : i32
    %c0_i32_0 = arith.constant 0 : i32
    %c0_i32_1 = arith.constant 0 : i32
    return %c0_i32, %c0_i32_0 : i32, i32
  }
  func.func @transform_4(%arg0: i32) -> (i32, i32) {
    %c0_i32 = arith.constant 0 : i32
    %c0_i32_0 = arith.constant 0 : i32
    %c0_i32_1 = arith.constant 0 : i32
    return %c0_i32, %c0_i32_0 : i32, i32
  }
  func.func @transform_5(%arg0: i32) -> (i32, i32) {
    %c0_i32 = arith.constant 0 : i32
    %c0_i32_0 = arith.constant 0 : i32
    return %arg0, %c0_i32 : i32, i32
  }
}

</mosaic_0001>

<bundles_post_ra>
// kernel: autoencoder_forward.1
= control target key start
LH: loop header
LB: loop body
LE: loop exit
PB: predicated region body
PF: predicated region fallthrough
CT: control target
= control target key end

     0   :  { %10 = vsyncpa [#allocation3], 0  ;;  %s1079_s0 = inlined_call_operand.vmem [shape: f32[8,1024], index: 0, kind: input, shape index: {}]   ;;  %s1080_s1 = inlined_call_operand.hbm [shape: f32[1024,128], index: 1, kind: input, shape index: {}]   ;;  %s1081_s2 = inlined_call_operand.vmem [shape: f32[1,128], index: 2, kind: input, shape index: {}]   ;;  %s1082_s3 = inlined_call_operand.hbm [shape: f32[128,1024], index: 3, kind: input, shape index: {}]   ;;  %s1083_s4 = inlined_call_operand.vmem [shape: f32[1,1024], index: 4, kind: input, shape index: {}]   ;;  %s1084_s5 = inlined_call_operand.vmem [shape: f32[8,1024], index: 5, kind: output, shape index: {}]  }
   0x1   :  { %s18_s20 = sshll.u32 %s1080_s1, 4  ;;  %s19_s20 = int_to_ptr.hbm [resolvable:$true] %s18_s20 }
   0x2   :  { %11 = vsyncpa [#allocation5], 0  ;;  %s924_s21 = smov [#allocation2]   ;;  %s33_s25 = sshll.u32 %s1082_s3, 4  ;;  %s34_s25 = int_to_ptr.hbm [resolvable:$true] %s33_s25 }
   0x3   :  { %s20_s22 = sshll.u32 %s924_s21, 4  ;;  %s925_s26 = smov 128   ;;  %s21_s22 = int_to_ptr.vmem [resolvable:$true] %s20_s22 }
   0x4   :  { %s926_s27 = smov 8   ;;  %s927_s28 = smov [#allocation4]  }
   0x5   :  { %26 = dma.hbm_to_vmem [thread:$0]  %s19_s20, 16384, %s21_s22, [#allocation3], %s925_s26, %s925_s26, %s926_s27  }
   0x6   :  { %s35_s29 = sshll.u32 %s927_s28, 4  ;;  %s928_s30 = smov 1024   ;;  %s36_s29 = int_to_ptr.vmem [resolvable:$true] %s35_s29 }
   0x7   :  { %s929_s6 = smov 64  }
   0x8   :  { %41 = dma.hbm_to_vmem [thread:$0]  %s34_s25, 16384, %s36_s29, [#allocation5], %s928_s30, %s928_s30, %s929_s6  }
   0x9   :  { %920 = dma.done.wait [#allocation3], 16384  }
   0xa   :  { %921 = vsyncadd [#allocation3], 4294950912 }
   0xb   :  { %922 = dma.done.wait [#allocation5], 16384  }
   0xc   :  { %923 = vsyncadd [#allocation5], 4294950912  ;;  %v107_v0 = vld [vmem:[#allocation2 + $0x178] sm:$0xff]  ;;  %v106_v2 = vld [vmem:[#allocation2 + $0x170] sm:$0xff] }
   0xd   :  { %v75_v1 = vld [vmem:[#allocation2 + $0x78] sm:$0xff]  ;;  %232 = vmatpush.msra.mxu2 %v107_v0  ;;  %v74_v4 = vld [vmem:[#allocation2 + $0x70] sm:$0xff]  ;;  %v105_v6 = vld [vmem:[#allocation2 + $0x168] sm:$0xff] }
   0xe   :  { %192 = vmatpush.msra.mxu0 %v75_v1  ;;  %v123_v3 = vld [vmem:[#allocation2 + $0x1f8] sm:$0xff]  ;;  %v122_v7 = vld [vmem:[#allocation2 + $0x1f0] sm:$0xff]  ;;  %v73_v8 = vld [vmem:[#allocation2 + $0x68] sm:$0xff] }
   0xf   :  { %v91_v5 = vld [vmem:[#allocation2 + $0xf8] sm:$0xff]  ;;  %252 = vmatpush.msra.mxu3 %v123_v3  ;;  %233 = vmatpush.msra.mxu2 %v106_v2  ;;  %v90_v9 = vld [vmem:[#allocation2 + $0xf0] sm:$0xff]  ;;  %v121_v10 = vld [vmem:[#allocation2 + $0x1e8] sm:$0xff] }
  0x10   :  { %212 = vmatpush.msra.mxu1 %v91_v5  ;;  %193 = vmatpush.msra.mxu0 %v74_v4  ;;  %v104_v11 = vld [vmem:[#allocation2 + $0x160] sm:$0xff]  ;;  %v89_v13 = vld [vmem:[#allocation2 + $0xe8] sm:$0xff]  ;;  %v103_v16 = vld [vmem:[#allocation2 + $0x158] sm:$0xff] }
  0x11   :  { %253 = vmatpush.msra.mxu3 %v122_v7  ;;  %v72_v12 = vld [vmem:[#allocation2 + $0x60] sm:$0xff]  ;;  %234 = vmatpush.msra.mxu2 %v105_v6  ;;  %v71_v17 = vld [vmem:[#allocation2 + $0x58] sm:$0xff]  ;;  %v102_v20 = vld [vmem:[#allocation2 + $0x150] sm:$0xff] }
  0x12   :  { %213 = vmatpush.msra.mxu1 %v90_v9  ;;  %194 = vmatpush.msra.mxu0 %v73_v8  ;;  %v120_v14 = vld [vmem:[#allocation2 + $0x1e0] sm:$0xff]  ;;  %v119_v18 = vld [vmem:[#allocation2 + $0x1d8] sm:$0xff]  ;;  %v70_v21 = vld [vmem:[#allocation2 + $0x50] sm:$0xff] }
  0x13   :  { %v88_v15 = vld [vmem:[#allocation2 + $0xe0] sm:$0xff]  ;;  %254 = vmatpush.msra.mxu3 %v121_v10  ;;  %235 = vmatpush.msra.mxu2 %v104_v11  ;;  %v87_v19 = vld [vmem:[#allocation2 + $0xd8] sm:$0xff]  ;;  %v118_v22 = vld [vmem:[#allocation2 + $0x1d0] sm:$0xff] }
  0x14   :  { %214 = vmatpush.msra.mxu1 %v89_v13  ;;  %195 = vmatpush.msra.mxu0 %v72_v12  ;;  %v86_v23 = vld [vmem:[#allocation2 + $0xd0] sm:$0xff]  ;;  %v101_v24 = vld [vmem:[#allocation2 + $0x148] sm:$0xff]  ;;  %v100_v28 = vld [vmem:[#allocation2 + $0x140] sm:$0xff] }
  0x15   :  { %255 = vmatpush.msra.mxu3 %v120_v14  ;;  %236 = vmatpush.msra.mxu2 %v103_v16  ;;  %v69_v25 = vld [vmem:[#allocation2 + $0x48] sm:$0xff]  ;;  %v68_v29 = vld [vmem:[#allocation2 + $0x40] sm:$0xff]  ;;  %v99_v32 = vld [vmem:[#allocation2 + $0x138] sm:$0xff] }
  0x16   :  { %215 = vmatpush.msra.mxu1 %v88_v15  ;;  %196 = vmatpush.msra.mxu0 %v71_v17  ;;  %v117_v26 = vld [vmem:[#allocation2 + $0x1c8] sm:$0xff]  ;;  %v116_v30 = vld [vmem:[#allocation2 + $0x1c0] sm:$0xff]  ;;  %v67_v33 = vld [vmem:[#allocation2 + $0x38] sm:$0xff] }
  0x17   :  { %256 = vmatpush.msra.mxu3 %v119_v18  ;;  %237 = vmatpush.msra.mxu2 %v102_v20  ;;  %v85_v27 = vld [vmem:[#allocation2 + $0xc8] sm:$0xff]  ;;  %v84_v31 = vld [vmem:[#allocation2 + $0xc0] sm:$0xff]  ;;  %v115_v34 = vld [vmem:[#allocation2 + $0x1b8] sm:$0xff] }
  0x18   :  { %216 = vmatpush.msra.mxu1 %v87_v19  ;;  %197 = vmatpush.msra.mxu0 %v70_v21  ;;  %v83_v35 = vld [vmem:[#allocation2 + $0xb8] sm:$0xff]  ;;  %v98_v36 = vld [vmem:[#allocation2 + $0x130] sm:$0xff]  ;;  %v97_v40 = vld [vmem:[#allocation2 + $0x128] sm:$0xff] }
  0x19   :  { %257 = vmatpush.msra.mxu3 %v118_v22  ;;  %238 = vmatpush.msra.mxu2 %v101_v24  ;;  %v66_v37 = vld [vmem:[#allocation2 + $0x30] sm:$0xff]  ;;  %v65_v41 = vld [vmem:[#allocation2 + $0x28] sm:$0xff]  ;;  %v96_v44 = vld [vmem:[#allocation2 + $0x120] sm:$0xff] }
  0x1a   :  { %217 = vmatpush.msra.mxu1 %v86_v23  ;;  %198 = vmatpush.msra.mxu0 %v69_v25  ;;  %v114_v38 = vld [vmem:[#allocation2 + $0x1b0] sm:$0xff]  ;;  %v113_v42 = vld [vmem:[#allocation2 + $0x1a8] sm:$0xff]  ;;  %v64_v45 = vld [vmem:[#allocation2 + $0x20] sm:$0xff] }
  0x1b   :  { %258 = vmatpush.msra.mxu3 %v117_v26  ;;  %239 = vmatpush.msra.mxu2 %v100_v28  ;;  %v82_v39 = vld [vmem:[#allocation2 + $0xb0] sm:$0xff]  ;;  %v81_v43 = vld [vmem:[#allocation2 + $0xa8] sm:$0xff]  ;;  %v112_v46 = vld [vmem:[#allocation2 + $0x1a0] sm:$0xff] }
  0x1c   :  { %218 = vmatpush.msra.mxu1 %v85_v27  ;;  %199 = vmatpush.msra.mxu0 %v68_v29  ;;  %v80_v47 = vld [vmem:[#allocation2 + $0xa0] sm:$0xff]  ;;  %v95_v48 = vld [vmem:[#allocation2 + $0x118] sm:$0xff]  ;;  %v94_v52 = vld [vmem:[#allocation2 + $0x110] sm:$0xff] }
  0x1d   :  { %259 = vmatpush.msra.mxu3 %v116_v30  ;;  %240 = vmatpush.msra.mxu2 %v99_v32  ;;  %v63_v49 = vld [vmem:[#allocation2 + $0x18] sm:$0xff]  ;;  %v62_v53 = vld [vmem:[#allocation2 + $0x10] sm:$0xff]  ;;  %v93_v56 = vld [vmem:[#allocation2 + $0x108] sm:$0xff] }
  0x1e   :  { %219 = vmatpush.msra.mxu1 %v84_v31  ;;  %200 = vmatpush.msra.mxu0 %v67_v33  ;;  %v111_v50 = vld [vmem:[#allocation2 + $0x198] sm:$0xff]  ;;  %v110_v54 = vld [vmem:[#allocation2 + $0x190] sm:$0xff]  ;;  %v61_v57 = vld [vmem:[#allocation2 + $0x8] sm:$0xff] }
  0x1f   :  { %260 = vmatpush.msra.mxu3 %v115_v34  ;;  %241 = vmatpush.msra.mxu2 %v98_v36  ;;  %v79_v51 = vld [vmem:[#allocation2 + $0x98] sm:$0xff]  ;;  %v78_v55 = vld [vmem:[#allocation2 + $0x90] sm:$0xff]  ;;  %v109_v58 = vld [vmem:[#allocation2 + $0x188] sm:$0xff] }
  0x20   :  { %220 = vmatpush.msra.mxu1 %v83_v35  ;;  %201 = vmatpush.msra.mxu0 %v66_v37  ;;  %v77_v59 = vld [vmem:[#allocation2 + $0x88] sm:$0xff]  ;;  %v92_v60 = vld [vmem:[#allocation2 + $0x100] sm:$0xff]  ;;  %v171_v62 = vld [vmem:[#allocation2 + $0x378] sm:$0xff] }
  0x21   :  { %261 = vmatpush.msra.mxu3 %v114_v38  ;;  %242 = vmatpush.msra.mxu2 %v97_v40  ;;  %v60_v61 = vld [vmem:[#allocation2] sm:$0xff]  ;;  %v139_v0 = vld [vmem:[#allocation2 + $0x278] sm:$0xff]  ;;  %v170_v2 = vld [vmem:[#allocation2 + $0x370] sm:$0xff] }
  0x22   :  { %221 = vmatpush.msra.mxu1 %v82_v39  ;;  %202 = vmatpush.msra.mxu0 %v65_v41  ;;  %v108_v63 = vld [vmem:[#allocation2 + $0x180] sm:$0xff]  ;;  %v187_v1 = vld [vmem:[#allocation2 + $0x3f8] sm:$0xff]  ;;  %v138_v4 = vld [vmem:[#allocation2 + $0x270] sm:$0xff] }
  0x23   :  { %262 = vmatpush.msra.mxu3 %v113_v42  ;;  %243 = vmatpush.msra.mxu2 %v96_v44  ;;  %v76_v3 = vld [vmem:[#allocation2 + $0x80] sm:$0xff]  ;;  %v155_v5 = vld [vmem:[#allocation2 + $0x2f8] sm:$0xff]  ;;  %v169_v6 = vld [vmem:[#allocation2 + $0x368] sm:$0xff] }
  0x24   :  { %222 = vmatpush.msra.mxu1 %v81_v43  ;;  %203 = vmatpush.msra.mxu0 %v64_v45  ;;  %v186_v7 = vld [vmem:[#allocation2 + $0x3f0] sm:$0xff]  ;;  %v137_v8 = vld [vmem:[#allocation2 + $0x268] sm:$0xff]  ;;  %v168_v10 = vld [vmem:[#allocation2 + $0x360] sm:$0xff] }
  0x25   :  { %263 = vmatpush.msra.mxu3 %v112_v46  ;;  %244 = vmatpush.msra.mxu2 %v95_v48  ;;  %v154_v9 = vld [vmem:[#allocation2 + $0x2f0] sm:$0xff]  ;;  %v185_v11 = vld [vmem:[#allocation2 + $0x3e8] sm:$0xff]  ;;  %v136_v12 = vld [vmem:[#allocation2 + $0x260] sm:$0xff] }
  0x26   :  { %223 = vmatpush.msra.mxu1 %v80_v47  ;;  %204 = vmatpush.msra.mxu0 %v63_v49  ;;  %v153_v13 = vld [vmem:[#allocation2 + $0x2e8] sm:$0xff]  ;;  %v167_v14 = vld [vmem:[#allocation2 + $0x358] sm:$0xff]  ;;  %v184_v15 = vld [vmem:[#allocation2 + $0x3e0] sm:$0xff] }
  0x27   :  { %264 = vmatpush.msra.mxu3 %v111_v50  ;;  %245 = vmatpush.msra.mxu2 %v94_v52  ;;  %v135_v16 = vld [vmem:[#allocation2 + $0x258] sm:$0xff]  ;;  %v152_v17 = vld [vmem:[#allocation2 + $0x2e0] sm:$0xff]  ;;  %v166_v18 = vld [vmem:[#allocation2 + $0x350] sm:$0xff] }
  0x28   :  { %224 = vmatpush.msra.mxu1 %v79_v51  ;;  %205 = vmatpush.msra.mxu0 %v62_v53  ;;  %v183_v19 = vld [vmem:[#allocation2 + $0x3d8] sm:$0xff]  ;;  %v134_v20 = vld [vmem:[#allocation2 + $0x250] sm:$0xff]  ;;  %v165_v22 = vld [vmem:[#allocation2 + $0x348] sm:$0xff] }
  0x29   :  { %265 = vmatpush.msra.mxu3 %v110_v54  ;;  %246 = vmatpush.msra.mxu2 %v93_v56  ;;  %v151_v21 = vld [vmem:[#allocation2 + $0x2d8] sm:$0xff]  ;;  %v182_v23 = vld [vmem:[#allocation2 + $0x3d0] sm:$0xff]  ;;  %v133_v24 = vld [vmem:[#allocation2 + $0x248] sm:$0xff] }
  0x2a   :  { %225 = vmatpush.msra.mxu1 %v78_v55  ;;  %206 = vmatpush.msra.mxu0 %v61_v57  ;;  %v150_v25 = vld [vmem:[#allocation2 + $0x2d0] sm:$0xff]  ;;  %v164_v26 = vld [vmem:[#allocation2 + $0x340] sm:$0xff]  ;;  %v181_v27 = vld [vmem:[#allocation2 + $0x3c8] sm:$0xff] }
  0x2b   :  { %266 = vmatpush.msra.mxu3 %v109_v58  ;;  %247 = vmatpush.msra.mxu2 %v92_v60  ;;  %v132_v28 = vld [vmem:[#allocation2 + $0x240] sm:$0xff]  ;;  %v149_v29 = vld [vmem:[#allocation2 + $0x2c8] sm:$0xff]  ;;  %v163_v30 = vld [vmem:[#allocation2 + $0x338] sm:$0xff] }
  0x2c   :  { %226 = vmatpush.msra.mxu1 %v77_v59  ;;  %207 = vmatpush.msra.mxu0 %v60_v61  ;;  %v180_v31 = vld [vmem:[#allocation2 + $0x3c0] sm:$0xff]  ;;  %v131_v32 = vld [vmem:[#allocation2 + $0x238] sm:$0xff]  ;;  %v162_v34 = vld [vmem:[#allocation2 + $0x330] sm:$0xff] }
  0x2d   :  { %312 = vmatpush.msrb.mxu2 %v171_v62  ;;  %267 = vmatpush.msra.mxu3 %v108_v63  ;;  %v148_v33 = vld [vmem:[#allocation2 + $0x2c0] sm:$0xff]  ;;  %v179_v35 = vld [vmem:[#allocation2 + $0x3b8] sm:$0xff]  ;;  %v130_v36 = vld [vmem:[#allocation2 + $0x230] sm:$0xff] }
  0x2e   :  { %272 = vmatpush.msrb.mxu0 %v139_v0  ;;  %227 = vmatpush.msra.mxu1 %v76_v3  ;;  %v147_v37 = vld [vmem:[#allocation2 + $0x2b8] sm:$0xff]  ;;  %v161_v38 = vld [vmem:[#allocation2 + $0x328] sm:$0xff]  ;;  %v178_v39 = vld [vmem:[#allocation2 + $0x3b0] sm:$0xff] }
  0x2f   :  { %332 = vmatpush.msrb.mxu3 %v187_v1  ;;  %313 = vmatpush.msrb.mxu2 %v170_v2  ;;  %v129_v40 = vld [vmem:[#allocation2 + $0x228] sm:$0xff]  ;;  %v146_v41 = vld [vmem:[#allocation2 + $0x2b0] sm:$0xff]  ;;  %v160_v42 = vld [vmem:[#allocation2 + $0x320] sm:$0xff] }
  0x30   :  { %273 = vmatpush.msrb.mxu0 %v138_v4  ;;  %292 = vmatpush.msrb.mxu1 %v155_v5  ;;  %v177_v43 = vld [vmem:[#allocation2 + $0x3a8] sm:$0xff]  ;;  %v54_v44 = vld [vmem:[%s1079_s0 + $0x10] sm:$0xff]  ;;  %v128_v45 = vld [vmem:[#allocation2 + $0x220] sm:$0xff] }
  0x31   :  { %314 = vmatpush.msrb.mxu2 %v169_v6  ;;  %333 = vmatpush.msrb.mxu3 %v186_v7  ;;  %v145_v46 = vld [vmem:[#allocation2 + $0x2a8] sm:$0xff]  ;;  %v159_v47 = vld [vmem:[#allocation2 + $0x318] sm:$0xff]  ;;  %v176_v48 = vld [vmem:[#allocation2 + $0x3a0] sm:$0xff] }
  0x32   :  { %274 = vmatpush.msrb.mxu0 %v137_v8  ;;  %293 = vmatpush.msrb.mxu1 %v154_v9  ;;  %v52_v49 = vld [vmem:[%s1079_s0] sm:$0xff]  ;;  %v55_v50 = vld [vmem:[%s1079_s0 + $0x18] sm:$0xff]  ;;  %v158_v53 = vld [vmem:[#allocation2 + $0x310] sm:$0xff] }
  0x33   :  { %315 = vmatpush.msrb.mxu2 %v168_v10  ;;  %334 = vmatpush.msrb.mxu3 %v185_v11  ;;  %v127_v51 = vld [vmem:[#allocation2 + $0x218] sm:$0xff]  ;;  %v144_v52 = vld [vmem:[#allocation2 + $0x2a0] sm:$0xff]  ;;  %v53_v55 = vld [vmem:[%s1079_s0 + $0x8] sm:$0xff] }
  0x34   :  { %275 = vmatpush.msrb.mxu0 %v136_v12  ;;  %294 = vmatpush.msrb.mxu1 %v153_v13  ;;  %v175_v54 = vld [vmem:[#allocation2 + $0x398] sm:$0xff]  ;;  %v126_v56 = vld [vmem:[#allocation2 + $0x210] sm:$0xff]  ;;  %v157_v58 = vld [vmem:[#allocation2 + $0x308] sm:$0xff] }
  0x35   :  { %316 = vmatpush.msrb.mxu2 %v167_v14  ;;  %335 = vmatpush.msrb.mxu3 %v184_v15  ;;  %v143_v57 = vld [vmem:[#allocation2 + $0x298] sm:$0xff]  ;;  %v174_v59 = vld [vmem:[#allocation2 + $0x390] sm:$0xff]  ;;  %v125_v60 = vld [vmem:[#allocation2 + $0x208] sm:$0xff] }
  0x36   :  { %276 = vmatpush.msrb.mxu0 %v135_v16  ;;  %295 = vmatpush.msrb.mxu1 %v152_v17  ;;  %v142_v61 = vld [vmem:[#allocation2 + $0x290] sm:$0xff]  ;;  %v156_v62 = vld [vmem:[#allocation2 + $0x300] sm:$0xff]  ;;  %v173_v63 = vld [vmem:[#allocation2 + $0x388] sm:$0xff] }
  0x37   :  { %317 = vmatpush.msrb.mxu2 %v166_v18  ;;  %336 = vmatpush.msrb.mxu3 %v183_v19  ;;  %v58_v0 = vld [vmem:[%s1079_s0 + $0x30] sm:$0xff]  ;;  %v124_v1 = vld [vmem:[#allocation2 + $0x200] sm:$0xff]  ;;  %v141_v2 = vld [vmem:[#allocation2 + $0x288] sm:$0xff] }
  0x38   :  { %277 = vmatpush.msrb.mxu0 %v134_v20  ;;  %296 = vmatpush.msrb.mxu1 %v151_v21  ;;  %v172_v3 = vld [vmem:[#allocation2 + $0x380] sm:$0xff]  ;;  %v59_v5 = vld [vmem:[%s1079_s0 + $0x38] sm:$0xff]  ;;  %v57_v8 = vld [vmem:[%s1079_s0 + $0x28] sm:$0xff] }
  0x39   :  { %318 = vmatpush.msrb.mxu2 %v165_v22  ;;  %337 = vmatpush.msrb.mxu3 %v182_v23  ;;  %v56_v4 = vld [vmem:[%s1079_s0 + $0x20] sm:$0xff]  ;;  %v475_v9 = vld [vmem:[#allocation4 + $0x3d0] sm:$0xff]  ;;  %v474_v10 = vld [vmem:[#allocation4 + $0x3c8] sm:$0xff] }
  0x3a   :  { %278 = vmatpush.msrb.mxu0 %v133_v24  ;;  %297 = vmatpush.msrb.mxu1 %v150_v25  ;;  %v140_v6 = vld [vmem:[#allocation2 + $0x280] sm:$0xff]  ;;  %v476_v11 = vld [vmem:[#allocation4 + $0x3d8] sm:$0xff]  ;;  %v467_v13 = vld [vmem:[#allocation4 + $0x390] sm:$0xff] }
  0x3b   :  { %319 = vmatpush.msrb.mxu2 %v164_v26  ;;  %338 = vmatpush.msrb.mxu3 %v181_v27  ;;  %v473_v7 = vld [vmem:[#allocation4 + $0x3c0] sm:$0xff]  ;;  %v466_v14 = vld [vmem:[#allocation4 + $0x388] sm:$0xff]  ;;  %v468_v15 = vld [vmem:[#allocation4 + $0x398] sm:$0xff] }
  0x3c   :  { %279 = vmatpush.msrb.mxu0 %v132_v28  ;;  %298 = vmatpush.msrb.mxu1 %v149_v29  ;;  %v465_v12 = vld [vmem:[#allocation4 + $0x380] sm:$0xff]  ;;  %v459_v17 = vld [vmem:[#allocation4 + $0x350] sm:$0xff]  ;;  %v458_v18 = vld [vmem:[#allocation4 + $0x348] sm:$0xff] }
  0x3d   :  { %320 = vmatpush.msrb.mxu2 %v163_v30  ;;  %339 = vmatpush.msrb.mxu3 %v180_v31  ;;  %v457_v16 = vld [vmem:[#allocation4 + $0x340] sm:$0xff]  ;;  %v460_v19 = vld [vmem:[#allocation4 + $0x358] sm:$0xff]  ;;  %v451_v21 = vld [vmem:[#allocation4 + $0x310] sm:$0xff] }
  0x3e   :  { %280 = vmatpush.msrb.mxu0 %v131_v32  ;;  %299 = vmatpush.msrb.mxu1 %v148_v33  ;;  %v449_v20 = vld [vmem:[#allocation4 + $0x300] sm:$0xff]  ;;  %v450_v22 = vld [vmem:[#allocation4 + $0x308] sm:$0xff]  ;;  %v452_v23 = vld [vmem:[#allocation4 + $0x318] sm:$0xff] }
  0x3f   :  { %321 = vmatpush.msrb.mxu2 %v162_v34  ;;  %340 = vmatpush.msrb.mxu3 %v179_v35  ;;  %v441_v24 = vld [vmem:[#allocation4 + $0x2c0] sm:$0xff]  ;;  %v443_v25 = vld [vmem:[#allocation4 + $0x2d0] sm:$0xff]  ;;  %v442_v26 = vld [vmem:[#allocation4 + $0x2c8] sm:$0xff] }
  0x40   :  { %281 = vmatpush.msrb.mxu0 %v130_v36  ;;  %300 = vmatpush.msrb.mxu1 %v147_v37  ;;  %v444_v27 = vld [vmem:[#allocation4 + $0x2d8] sm:$0xff]  ;;  %v433_v28 = vld [vmem:[#allocation4 + $0x280] sm:$0xff]  ;;  %v435_v29 = vld [vmem:[#allocation4 + $0x290] sm:$0xff] }
  0x41   :  { %322 = vmatpush.msrb.mxu2 %v161_v38  ;;  %341 = vmatpush.msrb.mxu3 %v178_v39  ;;  %v434_v30 = vld [vmem:[#allocation4 + $0x288] sm:$0xff]  ;;  %v436_v31 = vld [vmem:[#allocation4 + $0x298] sm:$0xff]  ;;  %v425_v32 = vld [vmem:[#allocation4 + $0x240] sm:$0xff] }
  0x42   :  { %282 = vmatpush.msrb.mxu0 %v129_v40  ;;  %301 = vmatpush.msrb.mxu1 %v146_v41  ;;  %v427_v33 = vld [vmem:[#allocation4 + $0x250] sm:$0xff]  ;;  %v426_v34 = vld [vmem:[#allocation4 + $0x248] sm:$0xff]  ;;  %v428_v35 = vld [vmem:[#allocation4 + $0x258] sm:$0xff] }
  0x43   :  { %323 = vmatpush.msrb.mxu2 %v160_v42  ;;  %342 = vmatpush.msrb.mxu3 %v177_v43  ;;  %v417_v36 = vld [vmem:[#allocation4 + $0x200] sm:$0xff]  ;;  %v419_v37 = vld [vmem:[#allocation4 + $0x210] sm:$0xff]  ;;  %v418_v38 = vld [vmem:[#allocation4 + $0x208] sm:$0xff] }
  0x44   :  { %248 = vmatmul.f32.vlgmr.msra.gmra.mxu2 %v54_v44  ;;  %283 = vmatpush.msrb.mxu0 %v128_v45  ;;  %v420_v39 = vld [vmem:[#allocation4 + $0x218] sm:$0xff]  ;;  %v409_v40 = vld [vmem:[#allocation4 + $0x1c0] sm:$0xff]  ;;  %v411_v41 = vld [vmem:[#allocation4 + $0x1d0] sm:$0xff] }
  0x45   :  { %302 = vmatpush.msrb.mxu1 %v145_v46  ;;  %324 = vmatpush.msrb.mxu2 %v159_v47  ;;  %v410_v42 = vld [vmem:[#allocation4 + $0x1c8] sm:$0xff]  ;;  %v412_v43 = vld [vmem:[#allocation4 + $0x1d8] sm:$0xff]  ;;  %v401_v44 = vld [vmem:[#allocation4 + $0x180] sm:$0xff] }
  0x46   :  { %343 = vmatpush.msrb.mxu3 %v176_v48  ;;  %208 = vmatmul.f32.vlgmr.msra.gmra.mxu0 %v52_v49  ;;  %v403_v45 = vld [vmem:[#allocation4 + $0x190] sm:$0xff]  ;;  %v402_v46 = vld [vmem:[#allocation4 + $0x188] sm:$0xff]  ;;  %v404_v47 = vld [vmem:[#allocation4 + $0x198] sm:$0xff] }
  0x47   :  { %268 = vmatmul.f32.vlgmr.msra.gmra.mxu3 %v55_v50  ;;  %284 = vmatpush.msrb.mxu0 %v127_v51  ;;  %v393_v48 = vld [vmem:[#allocation4 + $0x140] sm:$0xff]  ;;  %v395_v49 = vld [vmem:[#allocation4 + $0x150] sm:$0xff]  ;;  %v394_v50 = vld [vmem:[#allocation4 + $0x148] sm:$0xff] }
  0x48   :  { %303 = vmatpush.msrb.mxu1 %v144_v52  ;;  %325 = vmatpush.msrb.mxu2 %v158_v53  ;;  %v396_v51 = vld [vmem:[#allocation4 + $0x158] sm:$0xff]  ;;  %v385_v52 = vld [vmem:[#allocation4 + $0x100] sm:$0xff]  ;;  %v387_v53 = vld [vmem:[#allocation4 + $0x110] sm:$0xff] }
  0x49   :  { %344 = vmatpush.msrb.mxu3 %v175_v54  ;;  %228 = vmatmul.f32.vlgmr.msra.gmra.mxu1 %v53_v55  ;;  %v386_v54 = vld [vmem:[#allocation4 + $0x108] sm:$0xff]  ;;  %v388_v55 = vld [vmem:[#allocation4 + $0x118] sm:$0xff] }
  0x4a   :  { %285 = vmatpush.msrb.mxu0 %v126_v56  ;;  %304 = vmatpush.msrb.mxu1 %v143_v57  ;;  %v377_v56 = vld [vmem:[#allocation4 + $0xc0] sm:$0xff]  ;;  %v379_v57 = vld [vmem:[#allocation4 + $0xd0] sm:$0xff] }
  0x4b   :  { %326 = vmatpush.msrb.mxu2 %v157_v58  ;;  %345 = vmatpush.msrb.mxu3 %v174_v59  ;;  %v378_v58 = vld [vmem:[#allocation4 + $0xc8] sm:$0xff]  ;;  %v380_v59 = vld [vmem:[#allocation4 + $0xd8] sm:$0xff] }
  0x4c   :  { %286 = vmatpush.msrb.mxu0 %v125_v60  ;;  %305 = vmatpush.msrb.mxu1 %v142_v61  ;;  %v369_v60 = vld [vmem:[#allocation4 + $0x80] sm:$0xff]  ;;  %v371_v61 = vld [vmem:[#allocation4 + $0x90] sm:$0xff] }
  0x4d   :  { %327 = vmatpush.msrb.mxu2 %v156_v62  ;;  %346 = vmatpush.msrb.mxu3 %v173_v63  ;;  %v370_v62 = vld [vmem:[#allocation4 + $0x88] sm:$0xff]  ;;  %v372_v63 = vld [vmem:[#allocation4 + $0x98] sm:$0xff] }
  0x4e   :  { %328 = vmatmul.f32.vlgmr.msrb.gmra.mxu2 %v58_v0  ;;  %287 = vmatpush.msrb.mxu0 %v124_v1  ;;  %v361_v0 = vld [vmem:[#allocation4 + $0x40] sm:$0xff]  ;;  %v363_v1 = vld [vmem:[#allocation4 + $0x50] sm:$0xff] }
  0x4f   :  { %306 = vmatpush.msrb.mxu1 %v141_v2  ;;  %347 = vmatpush.msrb.mxu3 %v172_v3  ;;  %v362_v2 = vld [vmem:[#allocation4 + $0x48] sm:$0xff]  ;;  %v364_v3 = vld [vmem:[#allocation4 + $0x58] sm:$0xff] }
  0x50   :  { %288 = vmatmul.f32.vlgmr.msrb.gmra.mxu0 %v56_v4  ;;  %348 = vmatmul.f32.vlgmr.msrb.gmra.mxu3 %v59_v5  ;;  %v353_v4 = vld [vmem:[#allocation4] sm:$0xff]  ;;  %v355_v5 = vld [vmem:[#allocation4 + $0x10] sm:$0xff] }
  0x51   :  { %307 = vmatpush.msrb.mxu1 %v140_v6  ;;  %499 = vmatpush.msra.mxu0 %v473_v7  ;;  %v354_v6 = vld [vmem:[#allocation4 + $0x8] sm:$0xff]  ;;  %v356_v7 = vld [vmem:[#allocation4 + $0x18] sm:$0xff] }
  0x52   :  { %308 = vmatmul.f32.vlgmr.msrb.gmra.mxu1 %v57_v8  ;;  %539 = vmatpush.msra.mxu2 %v475_v9  ;;  %v477_v8 = vld [vmem:[#allocation4 + $0x3e0] sm:$0xff]  ;;  %v478_v9 = vld [vmem:[#allocation4 + $0x3e8] sm:$0xff] }
  0x53   :  { %519 = vmatpush.msra.mxu1 %v474_v10  ;;  %559 = vmatpush.msra.mxu3 %v476_v11  ;;  %v479_v10 = vld [vmem:[#allocation4 + $0x3f0] sm:$0xff]  ;;  %v480_v11 = vld [vmem:[#allocation4 + $0x3f8] sm:$0xff] }
  0x54   :  { %500 = vmatpush.msra.mxu0 %v465_v12  ;;  %540 = vmatpush.msra.mxu2 %v467_v13  ;;  %v469_v12 = vld [vmem:[#allocation4 + $0x3a0] sm:$0xff]  ;;  %v470_v13 = vld [vmem:[#allocation4 + $0x3a8] sm:$0xff] }
  0x55   :  { %520 = vmatpush.msra.mxu1 %v466_v14  ;;  %560 = vmatpush.msra.mxu3 %v468_v15  ;;  %v471_v14 = vld [vmem:[#allocation4 + $0x3b0] sm:$0xff]  ;;  %v472_v15 = vld [vmem:[#allocation4 + $0x3b8] sm:$0xff] }
  0x56   :  { %501 = vmatpush.msra.mxu0 %v457_v16  ;;  %541 = vmatpush.msra.mxu2 %v459_v17  ;;  %v461_v16 = vld [vmem:[#allocation4 + $0x360] sm:$0xff]  ;;  %v462_v17 = vld [vmem:[#allocation4 + $0x368] sm:$0xff] }
  0x57   :  { %521 = vmatpush.msra.mxu1 %v458_v18  ;;  %561 = vmatpush.msra.mxu3 %v460_v19  ;;  %v463_v18 = vld [vmem:[#allocation4 + $0x370] sm:$0xff]  ;;  %v464_v19 = vld [vmem:[#allocation4 + $0x378] sm:$0xff] }
  0x58   :  { %502 = vmatpush.msra.mxu0 %v449_v20  ;;  %542 = vmatpush.msra.mxu2 %v451_v21  ;;  %v453_v20 = vld [vmem:[#allocation4 + $0x320] sm:$0xff]  ;;  %v454_v21 = vld [vmem:[#allocation4 + $0x328] sm:$0xff] }
  0x59   :  { %522 = vmatpush.msra.mxu1 %v450_v22  ;;  %562 = vmatpush.msra.mxu3 %v452_v23  ;;  %v455_v22 = vld [vmem:[#allocation4 + $0x330] sm:$0xff]  ;;  %v456_v23 = vld [vmem:[#allocation4 + $0x338] sm:$0xff] }
  0x5a   :  { %503 = vmatpush.msra.mxu0 %v441_v24  ;;  %543 = vmatpush.msra.mxu2 %v443_v25  ;;  %v445_v24 = vld [vmem:[#allocation4 + $0x2e0] sm:$0xff]  ;;  %v446_v25 = vld [vmem:[#allocation4 + $0x2e8] sm:$0xff] }
  0x5b   :  { %523 = vmatpush.msra.mxu1 %v442_v26  ;;  %563 = vmatpush.msra.mxu3 %v444_v27  ;;  %v447_v26 = vld [vmem:[#allocation4 + $0x2f0] sm:$0xff]  ;;  %v448_v27 = vld [vmem:[#allocation4 + $0x2f8] sm:$0xff] }
  0x5c   :  { %504 = vmatpush.msra.mxu0 %v433_v28  ;;  %544 = vmatpush.msra.mxu2 %v435_v29  ;;  %v437_v28 = vld [vmem:[#allocation4 + $0x2a0] sm:$0xff]  ;;  %v438_v29 = vld [vmem:[#allocation4 + $0x2a8] sm:$0xff] }
  0x5d   :  { %524 = vmatpush.msra.mxu1 %v434_v30  ;;  %564 = vmatpush.msra.mxu3 %v436_v31  ;;  %v439_v30 = vld [vmem:[#allocation4 + $0x2b0] sm:$0xff]  ;;  %v440_v31 = vld [vmem:[#allocation4 + $0x2b8] sm:$0xff] }
  0x5e   :  { %505 = vmatpush.msra.mxu0 %v425_v32  ;;  %545 = vmatpush.msra.mxu2 %v427_v33  ;;  %v429_v32 = vld [vmem:[#allocation4 + $0x260] sm:$0xff]  ;;  %v430_v33 = vld [vmem:[#allocation4 + $0x268] sm:$0xff] }
  0x5f   :  { %525 = vmatpush.msra.mxu1 %v426_v34  ;;  %565 = vmatpush.msra.mxu3 %v428_v35  ;;  %v431_v34 = vld [vmem:[#allocation4 + $0x270] sm:$0xff]  ;;  %v432_v35 = vld [vmem:[#allocation4 + $0x278] sm:$0xff] }
  0x60   :  { %506 = vmatpush.msra.mxu0 %v417_v36  ;;  %546 = vmatpush.msra.mxu2 %v419_v37  ;;  %v421_v36 = vld [vmem:[#allocation4 + $0x220] sm:$0xff]  ;;  %v422_v37 = vld [vmem:[#allocation4 + $0x228] sm:$0xff] }
  0x61   :  { %526 = vmatpush.msra.mxu1 %v418_v38  ;;  %566 = vmatpush.msra.mxu3 %v420_v39  ;;  %v423_v38 = vld [vmem:[#allocation4 + $0x230] sm:$0xff]  ;;  %v424_v39 = vld [vmem:[#allocation4 + $0x238] sm:$0xff] }
  0x62   :  { %507 = vmatpush.msra.mxu0 %v409_v40  ;;  %547 = vmatpush.msra.mxu2 %v411_v41  ;;  %v413_v40 = vld [vmem:[#allocation4 + $0x1e0] sm:$0xff]  ;;  %v414_v41 = vld [vmem:[#allocation4 + $0x1e8] sm:$0xff] }
  0x63   :  { %527 = vmatpush.msra.mxu1 %v410_v42  ;;  %567 = vmatpush.msra.mxu3 %v412_v43  ;;  %v415_v42 = vld [vmem:[#allocation4 + $0x1f0] sm:$0xff]  ;;  %v416_v43 = vld [vmem:[#allocation4 + $0x1f8] sm:$0xff] }
  0x64   :  { %508 = vmatpush.msra.mxu0 %v401_v44  ;;  %548 = vmatpush.msra.mxu2 %v403_v45  ;;  %v405_v44 = vld [vmem:[#allocation4 + $0x1a0] sm:$0xff]  ;;  %v406_v45 = vld [vmem:[#allocation4 + $0x1a8] sm:$0xff] }
  0x65   :  { %528 = vmatpush.msra.mxu1 %v402_v46  ;;  %568 = vmatpush.msra.mxu3 %v404_v47  ;;  %v407_v46 = vld [vmem:[#allocation4 + $0x1b0] sm:$0xff]  ;;  %v408_v47 = vld [vmem:[#allocation4 + $0x1b8] sm:$0xff] }
  0x66   :  { %509 = vmatpush.msra.mxu0 %v393_v48  ;;  %549 = vmatpush.msra.mxu2 %v395_v49  ;;  %v397_v48 = vld [vmem:[#allocation4 + $0x160] sm:$0xff]  ;;  %v398_v49 = vld [vmem:[#allocation4 + $0x168] sm:$0xff] }
  0x67   :  { %529 = vmatpush.msra.mxu1 %v394_v50  ;;  %569 = vmatpush.msra.mxu3 %v396_v51  ;;  %v399_v50 = vld [vmem:[#allocation4 + $0x170] sm:$0xff]  ;;  %v400_v51 = vld [vmem:[#allocation4 + $0x178] sm:$0xff] }
  0x68   :  { %510 = vmatpush.msra.mxu0 %v385_v52  ;;  %550 = vmatpush.msra.mxu2 %v387_v53  ;;  %v389_v52 = vld [vmem:[#allocation4 + $0x120] sm:$0xff]  ;;  %v390_v53 = vld [vmem:[#allocation4 + $0x128] sm:$0xff] }
  0x69   :  { %530 = vmatpush.msra.mxu1 %v386_v54  ;;  %570 = vmatpush.msra.mxu3 %v388_v55  ;;  %v391_v54 = vld [vmem:[#allocation4 + $0x130] sm:$0xff]  ;;  %v392_v55 = vld [vmem:[#allocation4 + $0x138] sm:$0xff] }
  0x6a   :  { %511 = vmatpush.msra.mxu0 %v377_v56  ;;  %551 = vmatpush.msra.mxu2 %v379_v57  ;;  %v381_v56 = vld [vmem:[#allocation4 + $0xe0] sm:$0xff]  ;;  %v382_v57 = vld [vmem:[#allocation4 + $0xe8] sm:$0xff] }
  0x6b   :  { %531 = vmatpush.msra.mxu1 %v378_v58  ;;  %571 = vmatpush.msra.mxu3 %v380_v59  ;;  %v383_v58 = vld [vmem:[#allocation4 + $0xf0] sm:$0xff]  ;;  %v384_v59 = vld [vmem:[#allocation4 + $0xf8] sm:$0xff] }
  0x6c   :  { %512 = vmatpush.msra.mxu0 %v369_v60  ;;  %552 = vmatpush.msra.mxu2 %v371_v61  ;;  %v373_v60 = vld [vmem:[#allocation4 + $0xa0] sm:$0xff]  ;;  %v374_v61 = vld [vmem:[#allocation4 + $0xa8] sm:$0xff] }
  0x6d   :  { %532 = vmatpush.msra.mxu1 %v370_v62  ;;  %572 = vmatpush.msra.mxu3 %v372_v63  ;;  %v375_v62 = vld [vmem:[#allocation4 + $0xb0] sm:$0xff]  ;;  %v376_v63 = vld [vmem:[#allocation4 + $0xb8] sm:$0xff] }
  0x6e   :  { %513 = vmatpush.msra.mxu0 %v361_v0  ;;  %553 = vmatpush.msra.mxu2 %v363_v1  ;;  %v365_v0 = vld [vmem:[#allocation4 + $0x60] sm:$0xff]  ;;  %v366_v1 = vld [vmem:[#allocation4 + $0x68] sm:$0xff] }
  0x6f   :  { %533 = vmatpush.msra.mxu1 %v362_v2  ;;  %573 = vmatpush.msra.mxu3 %v364_v3  ;;  %v367_v2 = vld [vmem:[#allocation4 + $0x70] sm:$0xff]  ;;  %v368_v3 = vld [vmem:[#allocation4 + $0x78] sm:$0xff] }
  0x70   :  { %514 = vmatpush.msra.mxu0 %v353_v4  ;;  %554 = vmatpush.msra.mxu2 %v355_v5  ;;  %v357_v4 = vld [vmem:[#allocation4 + $0x20] sm:$0xff]  ;;  %v358_v5 = vld [vmem:[#allocation4 + $0x28] sm:$0xff] }
  0x71   :  { %534 = vmatpush.msra.mxu1 %v354_v6  ;;  %574 = vmatpush.msra.mxu3 %v356_v7  ;;  %v359_v6 = vld [vmem:[#allocation4 + $0x30] sm:$0xff]  ;;  %v360_v7 = vld [vmem:[#allocation4 + $0x38] sm:$0xff] }
  0x72   :  { %579 = vmatpush.msrb.mxu0 %v477_v8  ;;  %619 = vmatpush.msrb.mxu2 %v479_v10  ;;  %v839_v8 = vld [vmem:[%s1081_s2] ss:$0 sm:$0xff] }
  0x73   :  { %599 = vmatpush.msrb.mxu1 %v478_v9  ;;  %639 = vmatpush.msrb.mxu3 %v480_v11 }
  0x74   :  { %580 = vmatpush.msrb.mxu0 %v469_v12  ;;  %620 = vmatpush.msrb.mxu2 %v471_v14 }
  0x75   :  { %600 = vmatpush.msrb.mxu1 %v470_v13  ;;  %640 = vmatpush.msrb.mxu3 %v472_v15 }
  0x76   :  { %581 = vmatpush.msrb.mxu0 %v461_v16  ;;  %621 = vmatpush.msrb.mxu2 %v463_v18 }
  0x77   :  { %601 = vmatpush.msrb.mxu1 %v462_v17  ;;  %641 = vmatpush.msrb.mxu3 %v464_v19 }
  0x78   :  { %582 = vmatpush.msrb.mxu0 %v453_v20  ;;  %622 = vmatpush.msrb.mxu2 %v455_v22 }
  0x79   :  { %602 = vmatpush.msrb.mxu1 %v454_v21  ;;  %642 = vmatpush.msrb.mxu3 %v456_v23 }
  0x7a   :  { %583 = vmatpush.msrb.mxu0 %v445_v24  ;;  %623 = vmatpush.msrb.mxu2 %v447_v26  ;;  %v481_v26 = vld [vmem:[%s1083_s4] sm:$0xff] }
  0x7b   :  { %603 = vmatpush.msrb.mxu1 %v446_v25  ;;  %643 = vmatpush.msrb.mxu3 %v448_v27  ;;  %v483_v27 = vperm.slane %v481_v26, 0 }
  0x7c   :  { %584 = vmatpush.msrb.mxu0 %v437_v28  ;;  %624 = vmatpush.msrb.mxu2 %v439_v30  ;;  %v484_v28 = vperm.slane %v481_v26, 1 }
  0x7d   :  { %604 = vmatpush.msrb.mxu1 %v438_v29  ;;  %644 = vmatpush.msrb.mxu3 %v440_v31 }
  0x7e   :  { %585 = vmatpush.msrb.mxu0 %v429_v32  ;;  %625 = vmatpush.msrb.mxu2 %v431_v34 }
  0x7f   :  { %605 = vmatpush.msrb.mxu1 %v430_v33  ;;  %645 = vmatpush.msrb.mxu3 %v432_v35  ;;  %v485_v35 = vperm.slane %v481_v26, 2 }
  0x80   :  { %586 = vmatpush.msrb.mxu0 %v421_v36  ;;  %626 = vmatpush.msrb.mxu2 %v423_v38  ;;  %v486_v36 = vperm.slane %v481_v26, 3  ;;  %v488_v38 = vperm.slane %v481_v26, 5 }
  0x81   :  { %606 = vmatpush.msrb.mxu1 %v422_v37  ;;  %646 = vmatpush.msrb.mxu3 %v424_v39  ;;  %v487_v37 = vperm.slane %v481_v26, 4 }
  0x82   :  { %587 = vmatpush.msrb.mxu0 %v413_v40  ;;  %627 = vmatpush.msrb.mxu2 %v415_v42 }
  0x83   :  { %607 = vmatpush.msrb.mxu1 %v414_v41  ;;  %647 = vmatpush.msrb.mxu3 %v416_v43 }
  0x84   :  { %588 = vmatpush.msrb.mxu0 %v405_v44  ;;  %628 = vmatpush.msrb.mxu2 %v407_v46 }
  0x85   :  { %608 = vmatpush.msrb.mxu1 %v406_v45  ;;  %648 = vmatpush.msrb.mxu3 %v408_v47 }
  0x86   :  { %589 = vmatpush.msrb.mxu0 %v397_v48  ;;  %629 = vmatpush.msrb.mxu2 %v399_v50 }
  0x87   :  { %609 = vmatpush.msrb.mxu1 %v398_v49  ;;  %649 = vmatpush.msrb.mxu3 %v400_v51 }
  0x88   :  { %590 = vmatpush.msrb.mxu0 %v389_v52  ;;  %630 = vmatpush.msrb.mxu2 %v391_v54 }
  0x89   :  { %610 = vmatpush.msrb.mxu1 %v390_v53  ;;  %650 = vmatpush.msrb.mxu3 %v392_v55  ;;  %v489_v53 = vperm.slane %v481_v26, 6 }
  0x8a   :  { %591 = vmatpush.msrb.mxu0 %v381_v56  ;;  %631 = vmatpush.msrb.mxu2 %v383_v58  ;;  %v490_v56 = vperm.slane %v481_v26, 7 }
  0x8b   :  { %611 = vmatpush.msrb.mxu1 %v382_v57  ;;  %651 = vmatpush.msrb.mxu3 %v384_v59 }
  0x8c   :  { %592 = vmatpush.msrb.mxu0 %v373_v60  ;;  %632 = vmatpush.msrb.mxu2 %v375_v62 }
  0x8d   :  { %612 = vmatpush.msrb.mxu1 %v374_v61  ;;  %652 = vmatpush.msrb.mxu3 %v376_v63 }
  0x8e   :  { %593 = vmatpush.msrb.mxu0 %v365_v0  ;;  %633 = vmatpush.msrb.mxu2 %v367_v2 }
  0x8f   :  { %613 = vmatpush.msrb.mxu1 %v366_v1  ;;  %653 = vmatpush.msrb.mxu3 %v368_v3 }
  0x90   :  { %594 = vmatpush.msrb.mxu0 %v357_v4  ;;  %634 = vmatpush.msrb.mxu2 %v359_v6 }
  0x91   :  { %614 = vmatpush.msrb.mxu1 %v358_v5  ;;  %654 = vmatpush.msrb.mxu3 %v360_v7 }
  0xc3   :  { %v209_v9 = vpop.f32.mrf.mxu0 }
  0xc4   :  { %v210_v10 = vadd.f32 %v839_v8, %v209_v9 }
  0xc6   :  { %v229_v11 = vpop.f32.mrf.mxu1 }
  0xc7   :  { %v230_v12 = vadd.f32 %v229_v11, %v210_v10  ;;  %v249_v13 = vpop.f32.mrf.mxu2 }
  0xc9   :  { %v250_v14 = vadd.f32 %v249_v13, %v230_v12 }
  0xca   :  { %v269_v15 = vpop.f32.mrf.mxu3 }
  0xcb   :  { %v270_v16 = vadd.f32 %v269_v15, %v250_v14 }
  0xcd   :  { %v289_v17 = vpop.f32.mrf.mxu0 }
  0xce   :  { %v290_v18 = vadd.f32 %v289_v17, %v270_v16 }
  0xcf   :  { %v309_v19 = vpop.f32.mrf.mxu1 }
  0xd0   :  { %v310_v20 = vadd.f32 %v309_v19, %v290_v18 }
  0xd1   :  { %v329_v21 = vpop.f32.mrf.mxu2 }
  0xd2   :  { %v330_v22 = vadd.f32 %v329_v21, %v310_v20 }
  0xd3   :  { %v349_v23 = vpop.f32.mrf.mxu3 }
  0xd4   :  { %v350_v24 = vadd.f32 %v349_v23, %v330_v22 }
  0xd6   :  { %v352_v25 = vmax.f32 %v350_v24, 0.0 }
  0xd8   :  { %515 = vmatmul.f32.vlgmr.msra.gmra.mxu0 %v352_v25  ;;  %535 = vmatmul.f32.vlgmr.msra.gmra.mxu1 %v352_v25 }
  0xd9   :  { %555 = vmatmul.f32.vlgmr.msra.gmra.mxu2 %v352_v25  ;;  %575 = vmatmul.f32.vlgmr.msra.gmra.mxu3 %v352_v25 }
  0xe0   :  { %595 = vmatmul.f32.vlgmr.msrb.gmra.mxu0 %v352_v25  ;;  %615 = vmatmul.f32.vlgmr.msrb.gmra.mxu1 %v352_v25 }
  0xe1   :  { %635 = vmatmul.f32.vlgmr.msrb.gmra.mxu2 %v352_v25  ;;  %655 = vmatmul.f32.vlgmr.msrb.gmra.mxu3 %v352_v25 }
 0x155   :  { %v516_v29 = vpop.f32.mrf.mxu0  ;;  %v536_v30 = vpop.f32.mrf.mxu1 }
 0x156   :  { %v517_v31 = vadd.f32 %v516_v29, %v483_v27  ;;  %v537_v32 = vadd.f32 %v536_v30, %v484_v28 }
 0x158   :  { %v825_v33 = vmul.f32 -1.442695, %v517_v31  ;;  %v826_v34 = vmul.f32 -1.442695, %v537_v32 }
 0x15a   :  { %840 = vpow2.f32 %v825_v33 }
 0x15b   :  { %842 = vpow2.f32 %v826_v34 }
 0x15c   :  { %v556_v39 = vpop.f32.mrf.mxu2  ;;  %v576_v40 = vpop.f32.mrf.mxu3 }
 0x15d   :  { %v557_v41 = vadd.f32 %v556_v39, %v485_v35  ;;  %v577_v42 = vadd.f32 %v576_v40, %v486_v36  ;;  %v596_v43 = vpop.f32.mrf.mxu0  ;;  %v616_v44 = vpop.f32.mrf.mxu1 }
 0x15e   :  { %v597_v45 = vadd.f32 %v596_v43, %v487_v37  ;;  %v617_v46 = vadd.f32 %v616_v44, %v488_v38 }
 0x15f   :  { %v827_v47 = vmul.f32 -1.442695, %v557_v41  ;;  %v828_v48 = vmul.f32 -1.442695, %v577_v42 }
 0x160   :  { %v841_v49 = vpop.eup %840  ;;  %v829_v52 = vmul.f32 -1.442695, %v597_v45  ;;  %v830_v55 = vmul.f32 -1.442695, %v617_v46 }
 0x161   :  { %v843_v50 = vpop.eup %842  ;;  %v683_v51 = vadd.f32 1.0, %v841_v49  ;;  %844 = vpow2.f32 %v827_v47 }
 0x162   :  { %v684_v54 = vadd.f32 1.0, %v843_v50  ;;  %846 = vpow2.f32 %v828_v48 }
 0x163   :  { %848 = vrcp.f32 %v683_v51  ;;  %v700_v10 = vand.u32 2147483647, %v683_v51  ;;  %v702_v11 = vand.u32 2147483648, %v683_v51  ;;  %vm696_vm1 = vweird.f32 %v683_v51 }
 0x164   :  { %850 = vrcp.f32 %v684_v54  ;;  %v636_v57 = vpop.f32.mrf.mxu2  ;;  %v656_v58 = vpop.f32.mrf.mxu3  ;;  %v715_v13 = vand.u32 2147483647, %v684_v54  ;;  %v717_v14 = vand.u32 2147483648, %v684_v54  ;;  %vm711_vm4 = vweird.f32 %v684_v54 }
 0x165   :  { %852 = vpow2.f32 %v829_v52  ;;  %v637_v59 = vadd.f32 %v636_v57, %v489_v53  ;;  %v657_v62 = vadd.f32 %v656_v58, %v490_v56  ;;  %vm701_vm3 = vcmp.eq.f32.partialorder %v700_v10, 8.507059e+37 }
 0x166   :  { %854 = vpow2.f32 %v830_v55  ;;  %v703_v22 = vor.u32 1.1754944e-38, %v702_v11  ;;  %vm716_vm6 = vcmp.eq.f32.partialorder %v715_v13, 8.507059e+37  ;;  %v718_v27 = vor.u32 1.1754944e-38, %v717_v14 }
 0x167   :  { %v845_v60 = vpop.eup %844  ;;  %v831_v61 = vmul.f32 -1.442695, %v637_v59  ;;  %v832_v7 = vmul.f32 -1.442695, %v657_v62 }
 0x168   :  { %v847_v63 = vpop.eup %846  ;;  %v996_v0 = vadd.f32 1.0, %v845_v60 }
 0x169   :  { %v849_v1 = vpop.eup %848  ;;  %v998_v2 = vadd.f32 1.0, %v847_v63 }
 0x16a   :  { %v851_v3 = vpop.eup %850  ;;  %v692_v4 = vmul.f32 %v849_v1, %v683_v51  ;;  %856 = vrcp.f32 %v996_v0  ;;  %vm697_vm0 = vweird.f32 %v849_v1  ;;  %v730_v28 = vand.u32 2147483647, %v996_v0 }
 0x16b   :  { %v853_v5 = vpop.eup %852  ;;  %v707_v6 = vmul.f32 %v851_v3, %v684_v54  ;;  %858 = vpow2.f32 %v831_v61  ;;  %vm712_vm2 = vweird.f32 %v851_v3  ;;  %vm698_vm5 = vmor %vm696_vm1, %vm697_vm0  ;;  %v732_v34 = vand.u32 2147483648, %v996_v0 }
 0x16c   :  { %v855_v8 = vpop.eup %854  ;;  %v693_v9 = vsub.f32 1.0, %v692_v4  ;;  %860 = vrcp.f32 %v998_v2  ;;  %v1002_v16 = vadd.f32 1.0, %v853_v5  ;;  %vm713_vm7 = vmor %vm711_vm4, %vm712_vm2  ;;  %v745_v35 = vand.u32 2147483647, %v998_v2 }
 0x16d   :  { %v708_v12 = vsub.f32 1.0, %v707_v6  ;;  %v1004_v17 = vadd.f32 1.0, %v855_v8  ;;  %862 = vpow2.f32 %v832_v7  ;;  %v747_v36 = vand.u32 2147483648, %v998_v2 }
 0x16e   :  { %v694_v15 = vmul.f32 %v849_v1, %v693_v9  ;;  %864 = vrcp.f32 %v1002_v16  ;;  %vm726_vm9 = vweird.f32 %v996_v0  ;;  %vm1024_vm10 = vcmp.eq.f32.partialorder %v730_v28, 8.507059e+37 }
 0x16f   :  { %v709_v18 = vmul.f32 %v851_v3, %v708_v12  ;;  %866 = vrcp.f32 %v1004_v17  ;;  %vm741_vm11 = vweird.f32 %v998_v2  ;;  %v733_v48 = vor.u32 1.1754944e-38, %v732_v34 }
 0x170   :  { %v857_v19 = vpop.eup %856  ;;  %v695_v20 = vadd.f32 %v849_v1, %v694_v15  ;;  %vm1032_vm14 = vcmp.eq.f32.partialorder %v745_v35, 8.507059e+37  ;;  %v748_v50 = vor.u32 1.1754944e-38, %v747_v36  ;;  %v760_v56 = vand.u32 2147483647, %v1002_v16 }
 0x171   :  { %v859_v21 = vpop.eup %858  ;;  %v710_v23 = vadd.f32 %v851_v3, %v709_v18  ;;  %v722_v24 = vmul.f32 %v857_v19, %v996_v0  ;;  %vm727_vm8 = vweird.f32 %v857_v19  ;;  %v762_v57 = vand.u32 2147483648, %v1002_v16 }
 0x172   :  { %v861_v25 = vpop.eup %860  ;;  %v699_v26 = vsel %vm698_vm5, %v849_v1, %v695_v20  ;;  %v1021_v40 = vadd.f32 1.0, %v859_v21  ;;  %vm728_vm13 = vmor %vm726_vm9, %vm727_vm8  ;;  %vm756_vm1 = vweird.f32 %v1002_v16  ;;  %v777_v62 = vand.u32 2147483648, %v1004_v17 }
 0x173   :  { %v704_v29 = vsel %vm701_vm3, %v703_v22, %v699_v26  ;;  %v714_v30 = vsel %vm713_vm7, %v851_v3, %v710_v23  ;;  %v723_v31 = vsub.f32 1.0, %v722_v24  ;;  %v737_v32 = vmul.f32 %v861_v25, %v998_v2  ;;  %v863_v37 = vpop.eup %862 }
 0x174   :  { %811 = vst [vmem:[%s1084_s5] sm:$0xff] %v704_v29  ;;  %v719_v33 = vsel %vm716_vm6, %v718_v27, %v714_v30  ;;  %v865_v41 = vpop.eup %864  ;;  %vm742_vm12 = vweird.f32 %v861_v25  ;;  %v1030_v46 = vadd.f32 1.0, %v863_v37  ;;  %868 = vrcp.f32 %v1021_v40 }
 0x175   :  { %812 = vst [vmem:[%s1084_s5 + $0x8] sm:$0xff] %v719_v33  ;;  %v724_v38 = vmul.f32 %v857_v19, %v723_v31  ;;  %v738_v39 = vsub.f32 1.0, %v737_v32  ;;  %v752_v45 = vmul.f32 %v865_v41, %v1002_v16  ;;  %v867_v47 = vpop.eup %866  ;;  %vm743_vm15 = vmor %vm741_vm11, %vm742_vm12  ;;  %vm757_vm0 = vweird.f32 %v865_v41 }
 0x176   :  { %v767_v54 = vmul.f32 %v867_v47, %v1004_v17  ;;  %870 = vrcp.f32 %v1030_v46  ;;  %vm772_vm2 = vweird.f32 %v867_v47  ;;  %v775_v1 = vand.u32 2147483647, %v1004_v17  ;;  %vm758_vm3 = vmor %vm756_vm1, %vm757_vm0 }
 0x177   :  { %v725_v43 = vadd.f32 %v857_v19, %v724_v38  ;;  %v739_v44 = vmul.f32 %v861_v25, %v738_v39  ;;  %v753_v53 = vsub.f32 1.0, %v752_v45  ;;  %vm761_vm4 = vcmp.eq.f32.partialorder %v760_v56, 8.507059e+37 }
 0x178   :  { %v768_v60 = vsub.f32 1.0, %v767_v54  ;;  %v763_v3 = vor.u32 1.1754944e-38, %v762_v57  ;;  %vm771_vm5 = vweird.f32 %v1004_v17  ;;  %v778_v8 = vor.u32 1.1754944e-38, %v777_v62 }
 0x179   :  { %v729_v51 = vsel %vm728_vm13, %v857_v19, %v725_v43  ;;  %v740_v52 = vadd.f32 %v861_v25, %v739_v44  ;;  %v754_v59 = vmul.f32 %v865_v41, %v753_v53  ;;  %vm773_vm6 = vmor %vm771_vm5, %vm772_vm2  ;;  %vm776_vm7 = vcmp.eq.f32.partialorder %v775_v1, 8.507059e+37 }
 0x17a   :  { %v734_v55 = vsel %vm1024_vm10, %v733_v48, %v729_v51  ;;  %v769_v0 = vmul.f32 %v867_v47, %v768_v60  ;;  %v869_v2 = vpop.eup %868  ;;  %v792_v13 = vand.u32 2147483648, %v1021_v40  ;;  %v790_v16 = vand.u32 2147483647, %v1021_v40 }
 0x17b   :  { %813 = vst [vmem:[%s1084_s5 + $0x10] sm:$0xff] %v734_v55  ;;  %v744_v58 = vsel %vm743_vm15, %v861_v25, %v740_v52  ;;  %v755_v63 = vadd.f32 %v865_v41, %v754_v59  ;;  %v782_v6 = vmul.f32 %v869_v2, %v1021_v40  ;;  %vm787_vm8 = vweird.f32 %v869_v2 }
 0x17c   :  { %v749_v61 = vsel %vm1032_vm14, %v748_v50, %v744_v58  ;;  %v770_v5 = vadd.f32 %v867_v47, %v769_v0  ;;  %v871_v9 = vpop.eup %870  ;;  %vm786_vm9 = vweird.f32 %v1021_v40  ;;  %v807_v19 = vand.u32 2147483648, %v1030_v46 }
 0x17d   :  { %814 = vst [vmem:[%s1084_s5 + $0x18] sm:$0xff] %v749_v61  ;;  %v759_v4 = vsel %vm758_vm3, %v865_v41, %v755_v63  ;;  %v783_v11 = vsub.f32 1.0, %v782_v6  ;;  %v797_v14 = vmul.f32 %v871_v9, %v1030_v46  ;;  %vm788_vm10 = vmor %vm786_vm9, %vm787_vm8  ;;  %v793_v20 = vor.u32 1.1754944e-38, %v792_v13 }
 0x17e   :  { %v764_v7 = vsel %vm761_vm4, %v763_v3, %v759_v4  ;;  %v774_v10 = vsel %vm773_vm6, %v867_v47, %v770_v5  ;;  %vm802_vm11 = vweird.f32 %v871_v9  ;;  %v805_v22 = vand.u32 2147483647, %v1030_v46 }
 0x17f   :  { %815 = vst [vmem:[%s1084_s5 + $0x20] sm:$0xff] %v764_v7  ;;  %v779_v12 = vsel %vm776_vm7, %v778_v8, %v774_v10  ;;  %v784_v15 = vmul.f32 %v869_v2, %v783_v11  ;;  %v798_v17 = vsub.f32 1.0, %v797_v14  ;;  %vm791_vm12 = vcmp.eq.f32.partialorder %v790_v16, 8.507059e+37 }
 0x180   :  { %816 = vst [vmem:[%s1084_s5 + $0x28] sm:$0xff] %v779_v12  ;;  %vm801_vm13 = vweird.f32 %v1030_v46  ;;  %v808_v26 = vor.u32 1.1754944e-38, %v807_v19  ;;  %vm806_vm15 = vcmp.eq.f32.partialorder %v805_v22, 8.507059e+37 }
 0x181   :  { %v785_v18 = vadd.f32 %v869_v2, %v784_v15  ;;  %v799_v21 = vmul.f32 %v871_v9, %v798_v17  ;;  %vm803_vm14 = vmor %vm801_vm13, %vm802_vm11 }
 0x183   :  { %v789_v23 = vsel %vm788_vm10, %v869_v2, %v785_v18  ;;  %v800_v25 = vadd.f32 %v871_v9, %v799_v21 }
 0x184   :  { %v794_v24 = vsel %vm791_vm12, %v793_v20, %v789_v23 }
 0x185   :  { %817 = vst [vmem:[%s1084_s5 + $0x30] sm:$0xff] %v794_v24  ;;  %v804_v27 = vsel %vm803_vm14, %v871_v9, %v800_v25 }
 0x186   :  { %v809_v28 = vsel %vm806_vm15, %v808_v26, %v804_v27 }
 0x187   :  { %818 = vst [vmem:[%s1084_s5 + $0x38] sm:$0xff] %v809_v28 }
 0x188   :  { %823 = vsyncpa [#allocation3], 1 }
 0x189   :  { %824 = vsyncpa [#allocation5], 1 }

</bundles_post_ra>
